<compile_context>
chip_gen: v7x
topology: tpu7x:2x2x1
jax: 0.10.0
libtpu: 0.0.40
codegen_flags: <defaults>
</compile_context>

<pallas_src>
import jax
import jax.numpy as jnp
import numpy as np
from jax.experimental import pallas as pl
from jax.experimental.pallas import tpu as pltpu

# ---- model hyper-params (max_len is data-derived in the PyTorch script; fix it here) ----
MAX_LEN = 16              # sequence length L
C_OUT = 16                # conv1 out channels
K = 3                     # conv1 kernel size
L_OUT = MAX_LEN - K + 1   # = MAX_LEN - 2

assert 128 % MAX_LEN == 0, "lane-packing below assumes MAX_LEN divides 128"
PACK = 128 // MAX_LEN     # sequences packed per vreg row (= 8)
LANE = PACK * MAX_LEN     # = 128


def cnn_kernel(x_ref, w_ref, b_ref, o_ref):
    """One grid step: (TB, 128) packed rows -> (TB, 8) outputs.

    x_ref: (TB, LANE)  f32   8 sequences packed per row
    w_ref: (LANE, PACK) f32  block-diagonal tiling of w_eff (resident)
    b_ref: (1, PACK)   f32   broadcast scalar bias `const` (resident)
    o_ref: (TB, PACK)  f32
    """
    o_ref[...] = (
        jnp.dot(x_ref[...], w_ref[...], preferred_element_type=jnp.float32)
        + b_ref[...]
    )


def cnn_forward(x, w_conv, b_conv, w_fc, b_fc, *, block_rows=512):
    """x: (B, MAX_LEN) f32.  Returns (B,) f32 (mimics PyTorch .squeeze())."""
    B, L = x.shape
    assert L == MAX_LEN, f"expected sequence length {MAX_LEN}, got {L}"

    # ---- collapse conv + flatten + linear into a single affine map (wrapper-side) ----
    w_fc2d = w_fc.reshape(C_OUT, L_OUT).astype(jnp.float32)   # (C_OUT, L_OUT)
    w_conv2d = w_conv.reshape(C_OUT, K).astype(jnp.float32)   # (C_OUT, K)
    w_eff = jnp.zeros((MAX_LEN,), jnp.float32)
    for k in range(K):
        # coefficient of x[:, k:k+L_OUT]:  sum_c w_conv[c,k] * w_fc2d[c, :]
        w_eff = w_eff.at[k:k + L_OUT].add(w_conv2d[:, k] @ w_fc2d)
    const = jnp.sum(b_conv.astype(jnp.float32) * jnp.sum(w_fc2d, axis=1)) + b_fc[0]

    # ---- pack 8 sequences per lane-dense row; pad batch to the grid tile ----
    rows_needed = pl.cdiv(B, PACK)
    tb = min(block_rows, max(8, ((rows_needed + 7) // 8) * 8))   # multiple of 8 sublanes
    rows_pad = ((rows_needed + tb - 1) // tb) * tb
    b_pad = rows_pad * PACK

    x_pad = jnp.zeros((b_pad, MAX_LEN), jnp.float32).at[:B].set(x.astype(jnp.float32))
    x_packed = x_pad.reshape(rows_pad, LANE)                      # free row-major view

    # 8-way block-diagonal weight: (LANE, PACK), block (s,s) = w_eff
    w_bd = jnp.kron(jnp.eye(PACK, dtype=jnp.float32), w_eff[:, None])
    bias_row = jnp.full((1, PACK), const, jnp.float32)

    grid = (rows_pad // tb,)
    out = pl.pallas_call(
        cnn_kernel,
        out_shape=jax.ShapeDtypeStruct((rows_pad, PACK), jnp.float32),
        grid=grid,
        in_specs=[
            pl.BlockSpec((tb, LANE), lambda i: (i, 0)),       # streamed, double-buffered
            pl.BlockSpec((LANE, PACK), lambda i: (0, 0)),     # resident weight
            pl.BlockSpec((1, PACK), lambda i: (0, 0)),        # resident bias
        ],
        out_specs=pl.BlockSpec((tb, PACK), lambda i: (i, 0)),
        compiler_params=pltpu.CompilerParams(
            dimension_semantics=("parallel",),                # lets v7x use both TCs
        ),
    )(x_packed, w_bd, bias_row)

    out_flat = out.reshape(b_pad)[:B]       # (B,)
    return jnp.squeeze(out_flat)            # matches torch .squeeze() (0-d when B == 1)


def reference_forward(x, w_conv, b_conv, w_fc, b_fc):
    """Pure-JAX reference matching the PyTorch forward literally."""
    B = x.shape[0]
    conv = jnp.stack(
        [sum(w_conv[c, k] * x[:, k:k + L_OUT] for k in range(K)) + b_conv[c]
         for c in range(C_OUT)],
        axis=1,
    )                                            # (B, C_OUT, L_OUT)
    flat = conv.reshape(B, C_OUT * L_OUT)        # PyTorch view(x.size(0), -1)
    out = flat @ w_fc.reshape(-1) + b_fc[0]      # Linear(16*L_OUT, 1)
    return out                                   # (B,)


if __name__ == "__main__":
    key = jax.random.PRNGKey(0)
    kx, kw1, kb1, kw2, kb2 = jax.random.split(key, 5)

    B = 2
    x = jax.random.normal(kx, (B, MAX_LEN), dtype=jnp.float32)

    # Deterministic PyTorch-style uniform init
    bound1 = 1.0 / np.sqrt(1 * K)                       # conv1: fan_in = in_ch * k
    w_conv = jax.random.uniform(kw1, (C_OUT, K), jnp.float32, -bound1, bound1)
    b_conv = jax.random.uniform(kb1, (C_OUT,), jnp.float32, -bound1, bound1)
    bound2 = 1.0 / np.sqrt(C_OUT * L_OUT)               # fc1: fan_in = 16*(L-2)
    w_fc = jax.random.uniform(kw2, (1, C_OUT * L_OUT), jnp.float32, -bound2, bound2)
    b_fc = jax.random.uniform(kb2, (1,), jnp.float32, -bound2, bound2)

    out = cnn_forward(x, w_conv, b_conv, w_fc, b_fc)
    out = jax.block_until_ready(out)

    ref = reference_forward(x, w_conv, b_conv, w_fc, b_fc)
    np.testing.assert_allclose(np.asarray(out), np.asarray(ref), rtol=1e-4, atol=1e-4)
    assert out.shape == (B,)

    print("KERNEL_OK")
</pallas_src>

<mosaic_0001>
module attributes {stable_mosaic.version = 11 : i64} {
  func.func @cnn_kernel(%arg0: i32, %arg1: memref<8x128xf32, #tpu.memory_space<vmem>>, %arg2: memref<128x8xf32, #tpu.memory_space<vmem>>, %arg3: memref<1x8xf32, #tpu.memory_space<vmem>>, %arg4: memref<8x8xf32, #tpu.memory_space<vmem>>) attributes {dimension_semantics = [#tpu.dimension_semantics<parallel>], iteration_bounds = array<i64: 1>, scalar_prefetch = 0 : i64, scratch_operands = 0 : i64, tpu.core_type = #tpu.core_type<tc>, window_params = [{transform_indices = @transform_0, window_bounds = array<i64: 8, 128>}, {pipeline_mode = #tpu.pipeline_mode<synchronous>, transform_indices = @transform_1, window_bounds = array<i64: 128, 8>}, {pipeline_mode = #tpu.pipeline_mode<synchronous>, transform_indices = @transform_2, window_bounds = array<i64: 1, 8>}, {transform_indices = @transform_3, window_bounds = array<i64: 8, 8>}]} {
    %c0 = arith.constant 0 : index
    %c0_0 = arith.constant 0 : index
    %0 = vector.load %arg1[%c0, %c0_0] : memref<8x128xf32, #tpu.memory_space<vmem>>, vector<8x128xf32>
    %c0_1 = arith.constant 0 : index
    %c0_2 = arith.constant 0 : index
    %1 = vector.load %arg2[%c0_1, %c0_2] : memref<128x8xf32, #tpu.memory_space<vmem>>, vector<128x8xf32>
    %cst = arith.constant dense<0.000000e+00> : vector<8x8xf32>
    %2 = tpu.matmul %0, %1, %cst {dimension_numbers = #tpu.dot_dimension_numbers<[1], [0], [0], [1], [0, 0, 1, 1], [], []>} : vector<8x128xf32>, vector<128x8xf32>, vector<8x8xf32> -> vector<8x8xf32>
    %c0_3 = arith.constant 0 : index
    %c0_4 = arith.constant 0 : index
    %3 = vector.load %arg3[%c0_3, %c0_4] : memref<1x8xf32, #tpu.memory_space<vmem>>, vector<1x8xf32>
    %4 = vector.broadcast %3 : vector<1x8xf32> to vector<8x8xf32>
    %5 = arith.addf %2, %4 : vector<8x8xf32>
    %c0_5 = arith.constant 0 : index
    %c0_6 = arith.constant 0 : index
    %6 = vector.load %arg4[%c0_5, %c0_6] : memref<8x8xf32, #tpu.memory_space<vmem>>, vector<8x8xf32>
    tpu.vector_store %arg4[%c0_5, %c0_6], %5 {strides = array<i32>} : memref<8x8xf32, #tpu.memory_space<vmem>>, vector<8x8xf32>,
    return
  }
  func.func @transform_0(%arg0: i32) -> (i32, i32) {
    %c0_i32 = arith.constant 0 : i32
    %c0_i32_0 = arith.constant 0 : i32
    return %arg0, %c0_i32 : i32, i32
  }
  func.func @transform_1(%arg0: i32) -> (i32, i32) {
    %c0_i32 = arith.constant 0 : i32
    %c0_i32_0 = arith.constant 0 : i32
    %c0_i32_1 = arith.constant 0 : i32
    return %c0_i32, %c0_i32_0 : i32, i32
  }
  func.func @transform_2(%arg0: i32) -> (i32, i32) {
    %c0_i32 = arith.constant 0 : i32
    %c0_i32_0 = arith.constant 0 : i32
    %c0_i32_1 = arith.constant 0 : i32
    return %c0_i32, %c0_i32_0 : i32, i32
  }
  func.func @transform_3(%arg0: i32) -> (i32, i32) {
    %c0_i32 = arith.constant 0 : i32
    %c0_i32_0 = arith.constant 0 : i32
    return %arg0, %c0_i32 : i32, i32
  }
}

</mosaic_0001>

<bundles_post_ra>
// kernel: tpu_custom_call.1
= control target key start
LH: loop header
LB: loop body
LE: loop exit
PB: predicated region body
PF: predicated region fallthrough
CT: control target
= control target key end

     0   :  { %v230_v3 = vmov 0.0|0.0   ;;  %vm231_vm0 = vmmov 0   ;;  %v232_v6 = vmov 0.0   ;;  %s320_s0 = inlined_call_operand.vmem [shape: f32[8,128], index: 0, kind: input, shape index: {}]   ;;  %s321_s1 = inlined_call_operand.vmem [shape: f32[128,8], index: 1, kind: input, shape index: {}]   ;;  %s322_s2 = inlined_call_operand.vmem [shape: f32[1,8], index: 2, kind: input, shape index: {}]   ;;  %s323_s3 = inlined_call_operand.hbm [shape: f32[8,8], index: 3, kind: output, shape index: {}]  }
   0x1   :  { %v16_v0 = vld [vmem:[%s321_s1] sm:$0xff]  ;;  %v17_v1 = vld [vmem:[%s321_s1 + $0x8] sm:$0xff]  ;;  %v18_v2 = vld [vmem:[%s321_s1 + $0x10] sm:$0xff]  ;;  %178 = vmatprep.subr.bf16.mxu0 %v230_v3  ;;  %175 = vmatprep.mubr.msk.f32.mxu0 %vm231_vm0, %v232_v6 }
   0x2   :  { %v179_v4 = vpack.c.bf16 %v17_v1, %v16_v0  ;;  %v19_v5 = vld [vmem:[%s321_s1 + $0x18] sm:$0xff]  ;;  %v20_v8 = vld [vmem:[%s321_s1 + $0x20] sm:$0xff]  ;;  %v21_v9 = vld [vmem:[%s321_s1 + $0x28] sm:$0xff] }
   0x3   :  { %v182_v7 = vpack.c.bf16 %v19_v5, %v18_v2 }
   0x4   :  { %180 = vmatpush3.bf16.msra.mxu0 %v179_v4 }
   0x5   :  { %181 = vmatprep.subr.bf16.mxu0 %v230_v3 }
   0x6   :  { %8 = vsyncpa [#allocation3], 0  ;;  %v185_v10 = vpack.c.bf16 %v21_v9, %v20_v8  ;;  %v22_v11 = vld [vmem:[%s321_s1 + $0x30] sm:$0xff]  ;;  %v23_v12 = vld [vmem:[%s321_s1 + $0x38] sm:$0xff]  ;;  %s233_s21 = smov [#allocation2]   ;;  %vm109_vm1 = vcmask 64512  }
   0x7   :  { %v188_v13 = vpack.c.bf16 %v23_v12, %v22_v11  ;;  %v24_v14 = vld [vmem:[%s321_s1 + $0x40] sm:$0xff]  ;;  %v25_v15 = vld [vmem:[%s321_s1 + $0x48] sm:$0xff]  ;;  %v26_v17 = vld [vmem:[%s321_s1 + $0x50] sm:$0xff]  ;;  %s117_s22 = sshll.u32 %s233_s21, 4  ;;  %s118_s22 = int_to_ptr.vmem [resolvable:$true] %s117_s22 }
   0x8   :  { %183 = vmatpush3.bf16.msra.mxu0 %v182_v7  ;;  %v191_v16 = vpack.c.bf16 %v25_v15, %v24_v14  ;;  %v27_v18 = vld [vmem:[%s321_s1 + $0x58] sm:$0xff]  ;;  %v28_v20 = vld [vmem:[%s321_s1 + $0x60] sm:$0xff]  ;;  %v29_v21 = vld [vmem:[%s321_s1 + $0x68] sm:$0xff]  ;;  %p211_p1 = scmp.lt.s32.totalorder %s118_s22, %s118_s22 }
   0x9   :  { %184 = vmatprep.subr.bf16.mxu0 %v230_v3  ;;  %v194_v19 = vpack.c.bf16 %v27_v18, %v26_v17  ;;  %v197_v22 = vpack.c.bf16 %v29_v21, %v28_v20  ;;  %v30_v23 = vld [vmem:[%s321_s1 + $0x70] sm:$0xff]  ;;  %v31_v24 = vld [vmem:[%s321_s1 + $0x78] sm:$0xff]  ;;  %v15_v26 = vld [vmem:[%s320_s0] sm:$0xff]  ;;  %s206_s1 = scalar_lea.vmem %s118_s22, 128 }
   0xa   :  { %v200_v25 = vpack.c.bf16 %v31_v24, %v30_v23  ;;  %v125_v27 = vld [vmem:[%s322_s2] ss:$0 sm:$0xff]  ;;  %p207_p0 = scmp.ne.s32.totalorder %s118_s22, %s206_s1  ;;  %p212_p2 = scmp.lt.s32.totalorder %s206_s1, %s206_s1 }
   0xc   :  { %186 = vmatpush3.bf16.msra.mxu0 %v185_v10  ;;  %p213_p3 = por %p212_p2, %p211_p1 }
   0xd   :  { %187 = vmatprep.subr.bf16.mxu0 %v230_v3 }
   0xe   :  { %p214_p4 = pnand %p213_p3, %p207_p0 }
  0x10   :  { %189 = vmatpush3.bf16.msra.mxu0 %v188_v13 }
  0x11   :  { %190 = vmatprep.subr.bf16.mxu0 %v230_v3 }
  0x14   :  { %192 = vmatpush3.bf16.msra.mxu0 %v191_v16 }
  0x15   :  { %193 = vmatprep.subr.bf16.mxu0 %v230_v3 }
  0x18   :  { %195 = vmatpush3.bf16.msra.mxu0 %v194_v19 }
  0x19   :  { %196 = vmatprep.subr.bf16.mxu0 %v230_v3 }
  0x1c   :  { %198 = vmatpush3.bf16.msra.mxu0 %v197_v22 }
  0x1d   :  { %199 = vmatprep.subr.bf16.mxu0 %v230_v3 }
  0x20   :  { %201 = vmatpush3.bf16.msra.mxu0 %v200_v25 }
  0x23   :  { %176 = vmatmul.mubr.f32.vlgmr.msra.gmra.mrb[0].mxu0 %v15_v26 }
  0xf6   :  { %v105_v28 = vpop.f32.mrb[0].mxu0 }
  0xf7   :  { %v106_v29 = vadd.f32 %v125_v27, %v105_v28  ;;  %v177_v30 = vpop.f32.mrb[1].mxu0 }
  0xf9   :  { %110 = vst.msk [vmem:[#allocation2] sm:$0xff] %vm109_vm1, %v106_v29 }
  0xfa   :  { %217 = shalt.err (!%p214_p4)
}
  0xfb   :  { %s218_s24 = scalar_lea.hbm %s323_s3, 128 }
  0xfc   :  { %p219_p5 = scmp.ne.s32.totalorder %s323_s3, %s218_s24  ;;  %p222_p6 = scmp.lt.u32.totalorder %s218_s24, %s323_s3 }
  0xfe   :  { %p224_p7 = pnand %p222_p6, %p219_p5 }
 0x100   :  { %227 = shalt.err (!%p224_p7)
}
 0x101   :  { %120 = dma.vmem_to_hbm [thread:$0]  %s118_s22, 128, %s323_s3, [#allocation3]  }
 0x102   :  { %228 = dma.done.wait [#allocation3], 128  }
 0x103   :  { %229 = vsyncadd [#allocation3], 4294967168 }
 0x104   :  { %124 = vsyncpa [#allocation3], 1 }

</bundles_post_ra>
